<compile_context>
chip_gen: v6e
topology: v6e:2x2x1
jax: 0.10.0
libtpu: 0.0.40
codegen_flags: <defaults>
</compile_context>

<pallas_src>
import jax
import jax.numpy as jnp
from jax.experimental import pallas as pl
from jax.experimental.pallas import tpu as pltpu

B, CIN, H, W, COUT, K = 2, 3, 16, 16, 32, 3
EPS = 1e-5
HW = H * W                 # 256 lanes -> unmasked, lane-dense stores
KKC = K * K * CIN          # 27 contraction dim
KKCP = 32                  # zero-padded contraction dim (bf16 sublane tiling)


def conv_bn_mish_kernel(p_ref, w_ref, b_ref, o_ref):
    # p_ref: (KKCP, HW)   bf16 transposed im2col patches of one batch image
    # w_ref: (COUT, KKCP) bf16 conv weights with BN scale folded in
    # b_ref: (COUT, 1)    f32 folded BN bias
    # o_ref: (COUT, HW)   f32 output, already in NCHW channel-major order
    acc = jnp.dot(w_ref[...], p_ref[...],
                  preferred_element_type=jnp.float32)        # (COUT, HW)
    y = acc + b_ref[...]
    # Mish = y * tanh(softplus(y)); with e = exp(y):
    #   tanh(softplus(y)) = ((1+e)^2 - 1) / ((1+e)^2 + 1) = t2 / (t2 + 2)
    # Clamp exp argument: at y=20 the ratio is already 1.0 in f32, and the
    # clamp avoids inf*0 -> NaN for very large activations (free VPU min).
    e = jnp.exp(jnp.minimum(y, 20.0))
    t2 = e * (e + 2.0)
    o_ref[...] = y * t2 * pl.reciprocal(t2 + 2.0, approx=True)


def fold_params(conv_w, gamma, beta, running_mean, running_var):
    """One-time (model-load) prep: fold eval-mode BN, reorder & pad weights."""
    scale = gamma / jnp.sqrt(running_var + EPS)                       # (COUT,)
    bias = (beta - running_mean * scale).astype(jnp.float32).reshape(COUT, 1)
    # (COUT, CIN, kh, kw) -> (COUT, kh, kw, CIN) -> (COUT, 27); row order
    # (kh, kw, ci) matches the wrapper's channel-axis concat order.
    w_t = jnp.transpose(conv_w, (0, 2, 3, 1)).reshape(COUT, KKC)
    w_t = w_t * scale[:, None]
    w_t = jnp.pad(w_t, ((0, 0), (0, KKCP - KKC))).astype(jnp.bfloat16)
    return w_t, bias


@jax.jit
def yolov4_forward(x_nchw, w_folded, bias):
    """x_nchw: (B, CIN, H, W) f32  ->  (B, COUT, H, W) f32."""
    # im2col in NCHW order: pad spatial, 9 shifted slices stacked on the
    # channel axis, zero rows pad KKC -> KKCP.  No transposes; producer may
    # fuse into the pallas_call input (allow_input_fusion).
    xp = jnp.pad(x_nchw, ((0, 0), (0, 0), (1, 1), (1, 1)))
    slices = [xp[:, :, dh:dh + H, dw:dw + W]
              for dh in range(K) for dw in range(K)]
    slices.append(jnp.zeros((B, KKCP - KKC, H, W), x_nchw.dtype))
    patches = jnp.concatenate(slices, axis=1).reshape(B, KKCP, HW)
    patches = patches.astype(jnp.bfloat16)

    out = pl.pallas_call(
        conv_bn_mish_kernel,
        out_shape=jax.ShapeDtypeStruct((B, COUT, HW), jnp.float32),
        grid=(B,),
        in_specs=[
            pl.BlockSpec((None, KKCP, HW), lambda b: (b, 0, 0)),
            pl.BlockSpec((COUT, KKCP), lambda b: (0, 0)),
            pl.BlockSpec((COUT, 1), lambda b: (0, 0)),
        ],
        out_specs=pl.BlockSpec((None, COUT, HW), lambda b: (b, 0, 0)),
        compiler_params=pltpu.CompilerParams(
            dimension_semantics=("parallel",),       # v7x: one image per TC
            allow_input_fusion=[True, True, True],
        ),
        cost_estimate=pl.CostEstimate(
            flops=2 * B * HW * KKC * COUT,
            transcendentals=B * HW * COUT,
            bytes_accessed=(B * KKCP * HW * 2 + COUT * KKCP * 2
                            + COUT * 4 + B * COUT * HW * 4),
        ),
    )(patches, w_folded, bias)

    # (B, COUT, H*W) -> (B, COUT, H, W): contiguous, layout-free reshape.
    return out.reshape(B, COUT, H, W)


if __name__ == "__main__":
    key = jax.random.PRNGKey(0)
    k_x, k_w, k_g, k_b, k_m, k_v = jax.random.split(key, 6)

    # Deterministic synthetic parameters (shapes from YOLOV4.__init__).
    x = jax.random.normal(k_x, (B, CIN, H, W), jnp.float32)
    conv_w = jax.random.normal(k_w, (COUT, CIN, K, K), jnp.float32) * 0.1
    gamma = 1.0 + 0.1 * jax.random.normal(k_g, (COUT,), jnp.float32)
    beta = 0.1 * jax.random.normal(k_b, (COUT,), jnp.float32)
    running_mean = 0.1 * jax.random.normal(k_m, (COUT,), jnp.float32)
    running_var = 1.0 + 0.1 * jnp.abs(jax.random.normal(k_v, (COUT,), jnp.float32))

    # One-time parameter folding, hoisted out of the per-call path.
    w_folded, bias = fold_params(conv_w, gamma, beta, running_mean, running_var)
    w_folded = jax.block_until_ready(w_folded)
    bias = jax.block_until_ready(bias)

    out = yolov4_forward(x, w_folded, bias)
    jax.block_until_ready(out)
    assert out.shape == (B, COUT, H, W), out.shape
    print("KERNEL_OK")
</pallas_src>

<mosaic_0001>
module attributes {stable_mosaic.version = 11 : i64} {
  func.func @conv_bn_mish_kernel(%arg0: i32, %arg1: memref<1x32x256xbf16, #tpu.memory_space<vmem>>, %arg2: memref<32x32xbf16, #tpu.memory_space<vmem>>, %arg3: memref<32x1xf32, #tpu.memory_space<vmem>>, %arg4: memref<1x32x256xf32, #tpu.memory_space<vmem>>) attributes {dimension_semantics = [#tpu.dimension_semantics<parallel>], iteration_bounds = array<i64: 2>, scalar_prefetch = 0 : i64, scratch_operands = 0 : i64, tpu.core_type = #tpu.core_type<tc>, window_params = [{transform_indices = @transform_0, window_bounds = array<i64: 1, 32, 256>}, {pipeline_mode = #tpu.pipeline_mode<synchronous>, transform_indices = @transform_1, window_bounds = array<i64: 32, 32>}, {pipeline_mode = #tpu.pipeline_mode<synchronous>, transform_indices = @transform_2, window_bounds = array<i64: 32, 1>}, {transform_indices = @transform_3, window_bounds = array<i64: 1, 32, 256>}]} {
    %c0 = arith.constant 0 : index
    %c0_0 = arith.constant 0 : index
    %0 = vector.load %arg2[%c0, %c0_0] : memref<32x32xbf16, #tpu.memory_space<vmem>>, vector<32x32xbf16>
    %c0_1 = arith.constant 0 : index
    %c0_2 = arith.constant 0 : index
    %c0_3 = arith.constant 0 : index
    %1 = vector.load %arg1[%c0_1, %c0_2, %c0_3] : memref<1x32x256xbf16, #tpu.memory_space<vmem>>, vector<1x32x256xbf16>
    %2 = vector.shape_cast %1 : vector<1x32x256xbf16> to vector<32x256xbf16>
    %cst = arith.constant dense<0.000000e+00> : vector<32x256xf32>
    %3 = tpu.matmul %0, %2, %cst {dimension_numbers = #tpu.dot_dimension_numbers<[1], [0], [0], [1], [0, 0, 1, 1], [], []>} : vector<32x32xbf16>, vector<32x256xbf16>, vector<32x256xf32> -> vector<32x256xf32>
    %c0_4 = arith.constant 0 : index
    %c0_5 = arith.constant 0 : index
    %4 = vector.load %arg3[%c0_4, %c0_5] : memref<32x1xf32, #tpu.memory_space<vmem>>, vector<32x1xf32>
    %5 = vector.broadcast %4 : vector<32x1xf32> to vector<32x256xf32>
    %6 = arith.addf %3, %5 : vector<32x256xf32>
    %cst_6 = arith.constant 2.000000e+01 : f32
    %7 = vector.broadcast %cst_6 : f32 to vector<32x256xf32>
    %8 = arith.minimumf %6, %7 : vector<32x256xf32>
    %9 = math.exp %8 : vector<32x256xf32>
    %cst_7 = arith.constant 2.000000e+00 : f32
    %10 = vector.broadcast %cst_7 : f32 to vector<32x256xf32>
    %11 = arith.addf %9, %10 : vector<32x256xf32>
    %12 = arith.mulf %9, %11 : vector<32x256xf32>
    %13 = arith.mulf %6, %12 : vector<32x256xf32>
    %cst_8 = arith.constant 2.000000e+00 : f32
    %14 = vector.broadcast %cst_8 : f32 to vector<32x256xf32>
    %15 = arith.addf %12, %14 : vector<32x256xf32>
    %16 = tpu.reciprocal %15 {approx = true} : vector<32x256xf32> -> vector<32x256xf32>
    %17 = arith.mulf %13, %16 : vector<32x256xf32>
    %c0_9 = arith.constant 0 : index
    %c0_10 = arith.constant 0 : index
    %c0_11 = arith.constant 0 : index
    %18 = vector.load %arg4[%c0_9, %c0_10, %c0_11] : memref<1x32x256xf32, #tpu.memory_space<vmem>>, vector<1x32x256xf32>
    %19 = vector.shape_cast %18 : vector<1x32x256xf32> to vector<32x256xf32>
    %20 = vector.shape_cast %17 : vector<32x256xf32> to vector<1x32x256xf32>
    tpu.vector_store %arg4[%c0_9, %c0_10, %c0_11], %20 {strides = array<i32>} : memref<1x32x256xf32, #tpu.memory_space<vmem>>, vector<1x32x256xf32>,
    return
  }
  func.func @transform_0(%arg0: i32) -> (i32, i32, i32) {
    %c0_i32 = arith.constant 0 : i32
    %c0_i32_0 = arith.constant 0 : i32
    %c0_i32_1 = arith.constant 0 : i32
    return %arg0, %c0_i32, %c0_i32_0 : i32, i32, i32
  }
  func.func @transform_1(%arg0: i32) -> (i32, i32) {
    %c0_i32 = arith.constant 0 : i32
    %c0_i32_0 = arith.constant 0 : i32
    %c0_i32_1 = arith.constant 0 : i32
    return %c0_i32, %c0_i32_0 : i32, i32
  }
  func.func @transform_2(%arg0: i32) -> (i32, i32) {
    %c0_i32 = arith.constant 0 : i32
    %c0_i32_0 = arith.constant 0 : i32
    %c0_i32_1 = arith.constant 0 : i32
    return %c0_i32, %c0_i32_0 : i32, i32
  }
  func.func @transform_3(%arg0: i32) -> (i32, i32, i32) {
    %c0_i32 = arith.constant 0 : i32
    %c0_i32_0 = arith.constant 0 : i32
    %c0_i32_1 = arith.constant 0 : i32
    return %arg0, %c0_i32, %c0_i32_0 : i32, i32, i32
  }
}

</mosaic_0001>

<bundles_post_ra>
// kernel: yolov4_forward.1
= control target key start
LH: loop header
LB: loop body
LE: loop exit
PB: predicated region body
PF: predicated region fallthrough
CT: control target
= control target key end

     0   :  { %s534_s12 = smov 0   ;;  %s605_s0 = inlined_call_operand.vmem [shape: bf16[2,32,256], index: 0, kind: input, shape index: {}]   ;;  %s606_s1 = inlined_call_operand.vmem [shape: bf16[32,32], index: 1, kind: input, shape index: {}]   ;;  %s607_s2 = inlined_call_operand.vmem [shape: f32[32,1], index: 2, kind: input, shape index: {}]   ;;  %s608_s3 = inlined_call_operand.vmem [shape: f32[2,32,256], index: 3, kind: output, shape index: {}]  }
   0x1 LB: > { %s429_s13 = sadd.s32 4294967295, %s511_s12   ;;  %p433_p0 = scmp.ge.s32.totalorder %s511_s12, 1  ;;  %s511_s12 = sphi %s534_s12, %s13_s12  }
   0x2   : > { %p137_p1 = scmp.lt.s32.totalorder %s511_s12, 3 }
   0x4   : > { %p138_p2 = pnand %p433_p0, %p137_p1 }
   0x5   : > { %p161_p3 = scmp.lt.s32.totalorder (!%p138_p2), %s429_s13, 1 }
   0x6   : > { %141 = sbr.rel (%p138_p2) target bundleno = 267 (0x10b), region = 32 }
   0xb   : > { %v513_v0 = vmov 0   ;;  %s610_s13 = smov (!%p161_p3, %s429_s13), 1  ;;  %v182_v1 = vld [vmem:[%s607_s2 + $0x10] sm:$0xff]  ;;  %v180_v2 = vld [vmem:[%s607_s2] sm:$0xff]  ;;  %v183_v3 = vld [vmem:[%s607_s2 + $0x18] sm:$0xff]  ;;  %vm234_vm0 = vcmask 261120  }
   0xc   : > { %273 = vmatprep.mubr.bf16.mxu0 %v513_v0  ;;  %283 = vmatprep.mubr.bf16.mxu1 %v513_v0  ;;  %s448_s18 = sshll.u32 %s610_s13, 5  ;;  %v181_v4 = vld [vmem:[%s607_s2 + $0x8] sm:$0xff]  ;;  %v471_v9 = vld [vmem:[%s606_s1] sm:$0xff]   ;;  %s449_s30 = sshll.u32 %s610_s13, 6 }
   0xd   : > { %464 = vset.pattern.permute.xlu1 %v513_v0  ;;  %463 = vset.pattern.permute.xlu0 %v513_v0  ;;  %s165_s25 = scalar_lea.vmem %s605_s0, %s448_s18  ;;  %v472_v10 = vld [vmem:[%s606_s1 + $0x8] sm:$0xff]   ;;  %s170_s6 = scalar_lea.vmem %s608_s3, %s449_s30 }
   0xe   : > { %196 = vperm.xlu1 %464, %v182_v1   ;;  %186 = vperm.xlu0 %463, %v180_v2   ;;  %v465_v5 = vld [vmem:[%s165_s25 + $0x14] ss:$8 sps:$4 sm:$0xff]   ;;  %v467_v6 = vld [vmem:[%s165_s25 + $0x10] ss:$8 sps:$4 sm:$0xff]   ;;  %v468_v7 = vld [vmem:[%s165_s25 + $0x4] ss:$8 sps:$4 sm:$0xff]  }
   0xf   : > { %253 = vmatprep.subr.bf16.mxu0 %v465_v5  ;;  %450 = vmatprep.subr.bf16.mxu1 %v465_v5  ;;  %v470_v8 = vld [vmem:[%s165_s25] ss:$8 sps:$4 sm:$0xff]  }
  0x10   : > { %254 = vmatpush1.bf16.msra.mxu0 %v467_v6  ;;  %452 = vmatpush1.bf16.msra.mxu1 %v467_v6 }
  0x11   : > { %255 = vmatprep.subr.bf16.mxu0 %v468_v7  ;;  %451 = vmatprep.subr.bf16.mxu1 %v468_v7 }
  0x12   : > { %201 = vperm.xlu1 %464, %v183_v3   ;;  %191 = vperm.xlu0 %463, %v181_v4  }
  0x14   : > { %256 = vmatpush1.bf16.msra.mxu0 %v470_v8  ;;  %453 = vmatpush1.bf16.msra.mxu1 %v470_v8 }
  0x17   : > { %444 = vmatmul.mubr.msk.bf16.vlgmr.msra.gmra.mxu0 %vm234_vm0, %v471_v9  ;;  %445 = vmatmul.mubr.msk.bf16.vlgmr.msra.gmra.mxu1 %vm234_vm0, %v472_v10 }
  0x89   : > { %v197_v11 = vpop.permute.xlu1 %196  ;;  %v187_v12 = vpop.permute.xlu0 %186 }
  0x8d   : > { %v202_v27 = vpop.permute.xlu1 %201  ;;  %v192_v28 = vpop.permute.xlu0 %191 }
  0xd7   : > { %v275_v13 = vpop.f32.mrf.mxu0  ;;  %v285_v14 = vpop.f32.mrf.mxu1 }
  0xd8   : > { %v566_v15 = vadd.f32 %v275_v13, %v187_v12  ;;  %v568_v16 = vadd.f32 %v285_v14, %v197_v11 }
  0xd9   : > { %v277_v17 = vpop.f32.mrf.mxu0  ;;  %v287_v18 = vpop.f32.mrf.mxu1 }
  0xda   : > { %v294_v19 = vmin.f32 %v566_v15, 20.0  ;;  %v298_v20 = vmin.f32 %v568_v16, 20.0  ;;  %v572_v21 = vadd.f32 %v277_v17, %v187_v12  ;;  %v574_v22 = vadd.f32 %v287_v18, %v197_v11 }
  0xdb   : > { %v279_v23 = vpop.f32.mrf.mxu0  ;;  %v289_v24 = vpop.f32.mrf.mxu1 }
  0xdc   : > { %v302_v25 = vmul.f32 1.442695, %v294_v19  ;;  %v310_v26 = vmul.f32 1.442695, %v298_v20  ;;  %v295_v29 = vmin.f32 %v572_v21, 20.0  ;;  %v299_v30 = vmin.f32 %v574_v22, 20.0 }
  0xdd   : > { %v578_v31 = vadd.f32 %v279_v23, %v192_v28  ;;  %v580_v32 = vadd.f32 %v289_v24, %v202_v27  ;;  %v281_v33 = vpop.f32.mrf.mxu0  ;;  %v291_v34 = vpop.f32.mrf.mxu1 }
  0xde   : > { %473 = vpow2.f32 %v302_v25  ;;  %v304_v35 = vmul.f32 1.442695, %v295_v29  ;;  %v312_v36 = vmul.f32 1.442695, %v299_v30  ;;  %v582_v37 = vadd.f32 %v281_v33, %v192_v28 }
  0xdf   : > { %475 = vpow2.f32 %v310_v26  ;;  %v296_v38 = vmin.f32 %v578_v31, 20.0  ;;  %v300_v39 = vmin.f32 %v580_v32, 20.0  ;;  %v586_v40 = vadd.f32 %v291_v34, %v202_v27 }
  0xe0   : > { %477 = vpow2.f32 %v304_v35  ;;  %v297_v41 = vmin.f32 %v582_v37, 20.0 }
  0xe1   : > { %479 = vpow2.f32 %v312_v36  ;;  %v306_v42 = vmul.f32 1.442695, %v296_v38  ;;  %v314_v43 = vmul.f32 1.442695, %v300_v39  ;;  %v301_v44 = vmin.f32 %v586_v40, 20.0 }
  0xe2   : > { %v308_v45 = vmul.f32 1.442695, %v297_v41 }
  0xe3   : > { %481 = vpow2.f32 %v306_v42  ;;  %v316_v46 = vmul.f32 1.442695, %v301_v44 }
  0xe4   : > { %483 = vpow2.f32 %v314_v43 }
  0xe5   : > { %485 = vpow2.f32 %v308_v45 }
  0xe6   : > { %487 = vpow2.f32 %v316_v46 }
  0xeb   : > { %v474_v47 = vpop.eup %473 }
  0xec   : > { %v476_v48 = vpop.eup %475  ;;  %v318_v49 = vadd.f32 2.0, %v474_v47 }
  0xed   : > { %v478_v50 = vpop.eup %477  ;;  %v322_v51 = vadd.f32 2.0, %v476_v48 }
  0xee   : > { %v480_v52 = vpop.eup %479  ;;  %v326_v53 = vmul.f32 %v474_v47, %v318_v49  ;;  %v319_v54 = vadd.f32 2.0, %v478_v50 }
  0xef   : > { %v330_v55 = vmul.f32 %v476_v48, %v322_v51  ;;  %v323_v56 = vadd.f32 2.0, %v480_v52 }
  0xf0   : > { %v482_v57 = vpop.eup %481  ;;  %v342_v58 = vadd.f32 2.0, %v326_v53  ;;  %v327_v59 = vmul.f32 %v478_v50, %v319_v54  ;;  %v334_v17 = vmul.f32 %v326_v53, %v566_v15 }
  0xf1   : > { %v484_v60 = vpop.eup %483  ;;  %v346_v61 = vadd.f32 2.0, %v330_v55  ;;  %v331_v62 = vmul.f32 %v480_v52, %v323_v56  ;;  %v320_v63 = vadd.f32 2.0, %v482_v57  ;;  %v338_v19 = vmul.f32 %v330_v55, %v568_v16 }
  0xf2   : > { %v486_v0 = vpop.eup %485  ;;  %489 = vrcp.f32 %v342_v58  ;;  %v343_v1 = vadd.f32 2.0, %v327_v59  ;;  %v324_v2 = vadd.f32 2.0, %v484_v60  ;;  %v335_v24 = vmul.f32 %v327_v59, %v572_v21 }
  0xf3   : > { %v488_v3 = vpop.eup %487  ;;  %491 = vrcp.f32 %v346_v61  ;;  %v347_v4 = vadd.f32 2.0, %v331_v62  ;;  %v328_v5 = vmul.f32 %v482_v57, %v320_v63  ;;  %v321_v7 = vadd.f32 2.0, %v486_v0 }
  0xf4   : > { %493 = vrcp.f32 %v343_v1  ;;  %v332_v6 = vmul.f32 %v484_v60, %v324_v2  ;;  %v325_v8 = vadd.f32 2.0, %v488_v3  ;;  %v339_v27 = vmul.f32 %v331_v62, %v574_v22 }
  0xf5   : > { %495 = vrcp.f32 %v347_v4  ;;  %v344_v9 = vadd.f32 2.0, %v328_v5  ;;  %v329_v11 = vmul.f32 %v486_v0, %v321_v7  ;;  %v336_v30 = vmul.f32 %v328_v5, %v578_v31 }
  0xf6   : > { %v348_v10 = vadd.f32 2.0, %v332_v6  ;;  %v333_v12 = vmul.f32 %v488_v3, %v325_v8  ;;  %v340_v34 = vmul.f32 %v332_v6, %v580_v32 }
  0xf7   : > { %497 = vrcp.f32 %v344_v9  ;;  %v345_v13 = vadd.f32 2.0, %v329_v11  ;;  %v337_v21 = vmul.f32 %v329_v11, %v582_v37 }
  0xf8   : > { %499 = vrcp.f32 %v348_v10  ;;  %v349_v14 = vadd.f32 2.0, %v333_v12  ;;  %v341_v22 = vmul.f32 %v333_v12, %v586_v40 }
  0xf9   : > { %501 = vrcp.f32 %v345_v13 }
  0xfa   : > { %503 = vrcp.f32 %v349_v14 }
  0xff   : > { %v490_v18 = vpop.eup %489 }
 0x100   : > { %v492_v20 = vpop.eup %491  ;;  %v358_v23 = vmul.f32 %v490_v18, %v334_v17 }
 0x101   : > { %v494_v25 = vpop.eup %493  ;;  %v362_v26 = vmul.f32 %v492_v20, %v338_v19 }
 0x102   : > { %v496_v28 = vpop.eup %495  ;;  %366 = vst [vmem:[%s170_s6] sm:$0xff] %v358_v23  ;;  %v359_v29 = vmul.f32 %v494_v25, %v335_v24 }
 0x103   : > { %370 = vst [vmem:[%s170_s6 + $0x20] sm:$0xff] %v362_v26  ;;  %v363_v15 = vmul.f32 %v496_v28, %v339_v27 }
 0x104   : > { %v498_v33 = vpop.eup %497  ;;  %367 = vst [vmem:[%s170_s6 + $0x8] sm:$0xff] %v359_v29 }
 0x105   : > { %v500_v16 = vpop.eup %499  ;;  %371 = vst [vmem:[%s170_s6 + $0x28] sm:$0xff] %v363_v15  ;;  %v360_v35 = vmul.f32 %v498_v33, %v336_v30 }
 0x106   : > { %v364_v36 = vmul.f32 %v500_v16, %v340_v34  ;;  %v502_v38 = vpop.eup %501 }
 0x107   : > { %368 = vst [vmem:[%s170_s6 + $0x10] sm:$0xff] %v360_v35  ;;  %v504_v39 = vpop.eup %503  ;;  %v361_v41 = vmul.f32 %v502_v38, %v337_v21 }
 0x108   : > { %372 = vst [vmem:[%s170_s6 + $0x30] sm:$0xff] %v364_v36  ;;  %v365_v42 = vmul.f32 %v504_v39, %v341_v22 }
 0x109   : > { %369 = vst [vmem:[%s170_s6 + $0x18] sm:$0xff] %v361_v41 }
 0x10a   : > { %373 = vst [vmem:[%s170_s6 + $0x38] sm:$0xff] %v365_v42 }
 0x10b PF: > { %s13_s12 = sadd.s32 1, %s511_s12  }
 0x10c   : > { %p10_p4 = scmp.ge.s32.totalorder %s13_s12, 4  }
 0x10e   :  { %12 = sbr.rel (!%p10_p4) target bundleno = 1 (0x1), region = 62 }

</bundles_post_ra>
